<compile_context>
chip_gen: v7x
topology: tpu7x:2x2x1
jax: 0.10.0
libtpu: 0.0.40
codegen_flags: <defaults>
</compile_context>

<pallas_src>
import functools

import jax
import jax.numpy as jnp
from jax.experimental import pallas as pl
from jax.experimental.pallas import tpu as pltpu

# ----------------------------- configuration ------------------------------
B = 8     # batch
H = 32    # hidden_size  (4H = 128 -> per-layer gate block is one full vreg)
L = 2     # num_layers
O = 1     # output_size (== LSTM input_size, required by the fused seq variant)
DROPOUT = 0.2   # inference mode => identity
T_SEQ = 4       # time steps for the fused autoregressive decode


# --------------------------- in-kernel helpers -----------------------------
def _lstm_stack_step(inp, hs, cs, w_ih0, w_hh0, w_cat, b, *, num_layers, hidden):
    """One time step through the L-layer LSTM stack (values in, values out)."""
    Hh = hidden
    new_hs, new_cs = [], []
    for l in range(num_layers):                  # static unroll (sequential dep)
        h_prev, c_prev = hs[l], cs[l]
        if l == 0:
            # input_size == 1: (B,1)x(1,4H) outer product on the VPU, plus a
            # single (B,H)@(H,4H) MXU matmul for the recurrence.
            gates = inp * w_ih0 + jnp.dot(h_prev, w_hh0,
                                          preferred_element_type=jnp.float32)
        else:
            # fused input+recurrent matmul: (B,2H) @ (2H,4H) -> one MXU push.
            xh = jnp.concatenate([inp, h_prev], axis=-1)
            gates = jnp.dot(xh, w_cat[l - 1],
                            preferred_element_type=jnp.float32)
        gates = gates + b[l]                     # (B, 4H) == (8, 128)

        sig = jax.nn.sigmoid(gates)              # one full-vreg sigmoid
        i_g = sig[:, 0 * Hh:1 * Hh]
        f_g = sig[:, 1 * Hh:2 * Hh]
        o_g = sig[:, 3 * Hh:4 * Hh]
        g_g = jnp.tanh(gates[:, 2 * Hh:3 * Hh])  # tanh only on the g slice

        c_new = f_g * c_prev + i_g * g_g
        h_new = o_g * jnp.tanh(c_new)
        new_hs.append(h_new)
        new_cs.append(c_new)
        inp = h_new                              # feeds the next layer
    return inp, new_hs, new_cs


def _fc_head(h_top, fc_w_row, fc_b):
    """Linear(H, 1): VPU multiply + lane reduction instead of an MXU matmul."""
    return jnp.sum(h_top * fc_w_row, axis=-1, keepdims=True) + fc_b


# ------------------------------ Pallas kernels ------------------------------
def decoder_step_kernel(x_ref, h0_ref, c0_ref, w_ih0_ref, w_hh0_ref, w_cat_ref,
                        b_ref, fc_w_ref, fc_b_ref,
                        pred_ref, hc_ref, *, num_layers, hidden):
    hs = [h0_ref[l] for l in range(num_layers)]
    cs = [c0_ref[l] for l in range(num_layers)]
    w_cat = [w_cat_ref[l] for l in range(num_layers - 1)]
    b = [b_ref[l] for l in range(num_layers)]
    top, new_hs, new_cs = _lstm_stack_step(
        x_ref[...], hs, cs, w_ih0_ref[...], w_hh0_ref[...], w_cat, b,
        num_layers=num_layers, hidden=hidden)
    # dropout is identity at inference
    pred_ref[...] = _fc_head(top, fc_w_ref[...], fc_b_ref[...])
    # lane-dense packed state slab: [h_0 .. h_{L-1} | c_0 .. c_{L-1}] on lanes
    hc_ref[...] = jnp.concatenate(new_hs + new_cs, axis=-1)


def decoder_seq_kernel(x_ref, h0_ref, c0_ref, w_ih0_ref, w_hh0_ref, w_cat_ref,
                       b_ref, fc_w_ref, fc_b_ref,
                       preds_ref, hc_ref, *, num_layers, hidden, steps):
    """`steps` autoregressive decoder steps fused into one kernel invocation."""
    hs = [h0_ref[l] for l in range(num_layers)]
    cs = [c0_ref[l] for l in range(num_layers)]
    w_ih0 = w_ih0_ref[...]
    w_hh0 = w_hh0_ref[...]
    w_cat = [w_cat_ref[l] for l in range(num_layers - 1)]
    b = [b_ref[l] for l in range(num_layers)]
    fc_w = fc_w_ref[...]
    fc_b = fc_b_ref[...]
    inp = x_ref[...]
    for t in range(steps):          # static unroll: weights/state stay in vregs
        top, hs, cs = _lstm_stack_step(inp, hs, cs, w_ih0, w_hh0, w_cat, b,
                                       num_layers=num_layers, hidden=hidden)
        pred = _fc_head(top, fc_w, fc_b)
        preds_ref[t] = pred
        inp = pred                  # feed prediction back (output_size == 1)
    hc_ref[...] = jnp.concatenate(hs + cs, axis=-1)


# ------------------------------- wrappers -----------------------------------
_VMEM = functools.partial(pl.BlockSpec, memory_space=pltpu.MemorySpace.VMEM)


def _unpack_hc(hc):
    """(B, 2*L*H) lane-dense slab -> (h (L,B,H), c (L,B,H))."""
    hc4 = hc.reshape(B, 2, L, H)
    h_out = jnp.transpose(hc4[:, 0], (1, 0, 2))
    c_out = jnp.transpose(hc4[:, 1], (1, 0, 2))
    return h_out, c_out


def decoder_forward(x, h0, c0, params):
    """Single decoder step (matches Decoder.forward). Returns (pred, h, c)."""
    assert O == 1
    w_ih0, w_hh0, w_cat, b, fc_w, fc_b = params
    kern = functools.partial(decoder_step_kernel, num_layers=L, hidden=H)
    pred, hc = pl.pallas_call(
        kern,
        out_shape=(jax.ShapeDtypeStruct((B, O), jnp.float32),
                   jax.ShapeDtypeStruct((B, 2 * L * H), jnp.float32)),
        in_specs=[_VMEM()] * 9,
        out_specs=(_VMEM(), _VMEM()),
    )(x, h0, c0, w_ih0, w_hh0, w_cat, b, fc_w, fc_b)
    h_out, c_out = _unpack_hc(hc)
    return pred, h_out, c_out


def decoder_forward_seq(x, h0, c0, params, steps=T_SEQ):
    """Fused autoregressive decode: `steps` forward steps in ONE kernel call."""
    assert O == 1
    w_ih0, w_hh0, w_cat, b, fc_w, fc_b = params
    kern = functools.partial(decoder_seq_kernel, num_layers=L, hidden=H,
                             steps=steps)
    preds, hc = pl.pallas_call(
        kern,
        out_shape=(jax.ShapeDtypeStruct((steps, B, O), jnp.float32),
                   jax.ShapeDtypeStruct((B, 2 * L * H), jnp.float32)),
        in_specs=[_VMEM()] * 9,
        out_specs=(_VMEM(), _VMEM()),
    )(x, h0, c0, w_ih0, w_hh0, w_cat, b, fc_w, fc_b)
    h_out, c_out = _unpack_hc(hc)
    return preds, h_out, c_out


# -------------------------- pure-JAX reference -----------------------------
def decoder_ref(x, h0, c0, params):
    w_ih0, w_hh0, w_cat, b, fc_w, fc_b = params
    inp = x
    hs, cs = [], []
    for l in range(L):
        if l == 0:
            gates = inp @ w_ih0 + h0[l] @ w_hh0 + b[l]
        else:
            w = w_cat[l - 1]
            gates = inp @ w[:H] + h0[l] @ w[H:] + b[l]
        i_g = jax.nn.sigmoid(gates[:, 0 * H:1 * H])
        f_g = jax.nn.sigmoid(gates[:, 1 * H:2 * H])
        g_g = jnp.tanh(gates[:, 2 * H:3 * H])
        o_g = jax.nn.sigmoid(gates[:, 3 * H:4 * H])
        c_new = f_g * c0[l] + i_g * g_g
        h_new = o_g * jnp.tanh(c_new)
        hs.append(h_new)
        cs.append(c_new)
        inp = h_new
    pred = inp @ fc_w.T + fc_b
    return pred, jnp.stack(hs), jnp.stack(cs)


# --------------------------------- main -------------------------------------
if __name__ == "__main__":
    key = jax.random.PRNGKey(0)
    ks = jax.random.split(key, 11)
    bound = 1.0 / jnp.sqrt(H)  # PyTorch LSTM/Linear-style uniform init scale
    u = lambda k, shape: jax.random.uniform(k, shape, jnp.float32, -bound, bound)

    # Parameters (pre-transposed to (in, out); gate order [i, f, g, o]).
    w_ih0 = u(ks[0], (1, 4 * H))                     # layer-0 W_ih^T (input=1)
    w_hh0 = u(ks[1], (H, 4 * H))                     # layer-0 W_hh^T
    w_cat = jnp.stack([jnp.concatenate(              # layers>0: [W_ih^T; W_hh^T]
        [u(ks[2], (H, 4 * H)), u(ks[3], (H, 4 * H))], axis=0)])   # (L-1, 2H, 4H)
    b = u(ks[4], (L, 1, 4 * H)) + u(ks[5], (L, 1, 4 * H))         # b_ih + b_hh
    fc_w = u(ks[6], (O, H))                          # fc.weight (PyTorch layout)
    fc_b = u(ks[7], (1, O))
    params = (w_ih0, w_hh0, w_cat, b, fc_w, fc_b)

    # Inputs.
    x = jax.random.normal(ks[8], (B, 1), jnp.float32)
    h0 = jax.random.normal(ks[9], (L, B, H), jnp.float32)
    c0 = jax.random.normal(ks[10], (L, B, H), jnp.float32)

    # ---- single-step forward (the module's forward pass) ----
    pred, h_out, c_out = decoder_forward(x, h0, c0, params)
    jax.block_until_ready((pred, h_out, c_out))

    pred_r, h_r, c_r = decoder_ref(x, h0, c0, params)
    assert jnp.allclose(pred, pred_r, atol=1e-5, rtol=1e-5)
    assert jnp.allclose(h_out, h_r, atol=1e-5, rtol=1e-5)
    assert jnp.allclose(c_out, c_r, atol=1e-5, rtol=1e-5)

    # ---- fused multi-step autoregressive decode (launch/DMA amortized) ----
    preds, h_seq, c_seq = decoder_forward_seq(x, h0, c0, params, steps=T_SEQ)
    jax.block_until_ready((preds, h_seq, c_seq))

    preds_r = []
    inp_r, h_r2, c_r2 = x, h0, c0
    for _ in range(T_SEQ):
        p_r, h_r2, c_r2 = decoder_ref(inp_r, h_r2, c_r2, params)
        preds_r.append(p_r)
        inp_r = p_r
    preds_r = jnp.stack(preds_r)
    assert jnp.allclose(preds, preds_r, atol=1e-4, rtol=1e-4)
    assert jnp.allclose(h_seq, h_r2, atol=1e-4, rtol=1e-4)
    assert jnp.allclose(c_seq, c_r2, atol=1e-4, rtol=1e-4)

    print("KERNEL_OK")
</pallas_src>

<mosaic_0001>
module attributes {stable_mosaic.version = 11 : i64} {
  func.func @decoder_step_kernel(%arg0: memref<8x1xf32, #tpu.memory_space<vmem>>, %arg1: memref<2x8x32xf32, #tpu.memory_space<vmem>>, %arg2: memref<2x8x32xf32, #tpu.memory_space<vmem>>, %arg3: memref<1x128xf32, #tpu.memory_space<vmem>>, %arg4: memref<32x128xf32, #tpu.memory_space<vmem>>, %arg5: memref<1x64x128xf32, #tpu.memory_space<vmem>>, %arg6: memref<2x1x128xf32, #tpu.memory_space<vmem>>, %arg7: memref<1x32xf32, #tpu.memory_space<vmem>>, %arg8: memref<1x1xf32, #tpu.memory_space<vmem>>, %arg9: memref<8x1xf32, #tpu.memory_space<vmem>>, %arg10: memref<8x128xf32, #tpu.memory_space<vmem>>) attributes {dimension_semantics = [], scalar_prefetch = 0 : i64, scratch_operands = 0 : i64, tpu.core_type = #tpu.core_type<tc>} {
    %c0 = arith.constant 0 : index
    %c0_0 = arith.constant 0 : index
    %c0_1 = arith.constant 0 : index
    %0 = vector.load %arg1[%c0, %c0_0, %c0_1] : memref<2x8x32xf32, #tpu.memory_space<vmem>>, vector<1x8x32xf32>
    %1 = vector.shape_cast %0 : vector<1x8x32xf32> to vector<8x32xf32>
    %c1 = arith.constant 1 : index
    %c0_2 = arith.constant 0 : index
    %c0_3 = arith.constant 0 : index
    %2 = vector.load %arg1[%c1, %c0_2, %c0_3] : memref<2x8x32xf32, #tpu.memory_space<vmem>>, vector<1x8x32xf32>
    %3 = vector.shape_cast %2 : vector<1x8x32xf32> to vector<8x32xf32>
    %c0_4 = arith.constant 0 : index
    %c0_5 = arith.constant 0 : index
    %c0_6 = arith.constant 0 : index
    %4 = vector.load %arg2[%c0_4, %c0_5, %c0_6] : memref<2x8x32xf32, #tpu.memory_space<vmem>>, vector<1x8x32xf32>
    %5 = vector.shape_cast %4 : vector<1x8x32xf32> to vector<8x32xf32>
    %c1_7 = arith.constant 1 : index
    %c0_8 = arith.constant 0 : index
    %c0_9 = arith.constant 0 : index
    %6 = vector.load %arg2[%c1_7, %c0_8, %c0_9] : memref<2x8x32xf32, #tpu.memory_space<vmem>>, vector<1x8x32xf32>
    %7 = vector.shape_cast %6 : vector<1x8x32xf32> to vector<8x32xf32>
    %c0_10 = arith.constant 0 : index
    %c0_11 = arith.constant 0 : index
    %c0_12 = arith.constant 0 : index
    %8 = vector.load %arg5[%c0_10, %c0_11, %c0_12] : memref<1x64x128xf32, #tpu.memory_space<vmem>>, vector<1x64x128xf32>
    %9 = vector.shape_cast %8 : vector<1x64x128xf32> to vector<64x128xf32>
    %c0_13 = arith.constant 0 : index
    %c0_14 = arith.constant 0 : index
    %c0_15 = arith.constant 0 : index
    %10 = vector.load %arg6[%c0_13, %c0_14, %c0_15] : memref<2x1x128xf32, #tpu.memory_space<vmem>>, vector<1x1x128xf32>
    %11 = vector.shape_cast %10 : vector<1x1x128xf32> to vector<1x128xf32>
    %c1_16 = arith.constant 1 : index
    %c0_17 = arith.constant 0 : index
    %c0_18 = arith.constant 0 : index
    %12 = vector.load %arg6[%c1_16, %c0_17, %c0_18] : memref<2x1x128xf32, #tpu.memory_space<vmem>>, vector<1x1x128xf32>
    %13 = vector.shape_cast %12 : vector<1x1x128xf32> to vector<1x128xf32>
    %c0_19 = arith.constant 0 : index
    %c0_20 = arith.constant 0 : index
    %14 = vector.load %arg0[%c0_19, %c0_20] : memref<8x1xf32, #tpu.memory_space<vmem>>, vector<8x1xf32>
    %c0_21 = arith.constant 0 : index
    %c0_22 = arith.constant 0 : index
    %15 = vector.load %arg3[%c0_21, %c0_22] : memref<1x128xf32, #tpu.memory_space<vmem>>, vector<1x128xf32>
    %c0_23 = arith.constant 0 : index
    %c0_24 = arith.constant 0 : index
    %16 = vector.load %arg4[%c0_23, %c0_24] : memref<32x128xf32, #tpu.memory_space<vmem>>, vector<32x128xf32>
    %17 = vector.broadcast %14 : vector<8x1xf32> to vector<8x128xf32>
    %18 = vector.broadcast %15 : vector<1x128xf32> to vector<8x128xf32>
    %19 = arith.mulf %17, %18 : vector<8x128xf32>
    %cst = arith.constant dense<0.000000e+00> : vector<8x128xf32>
    %20 = tpu.matmul %1, %16, %cst {dimension_numbers = #tpu.dot_dimension_numbers<[1], [0], [0], [1], [0, 0, 1, 1], [], []>} : vector<8x32xf32>, vector<32x128xf32>, vector<8x128xf32> -> vector<8x128xf32>
    %21 = arith.addf %19, %20 : vector<8x128xf32>
    %22 = vector.broadcast %11 : vector<1x128xf32> to vector<8x128xf32>
    %23 = arith.addf %21, %22 : vector<8x128xf32>
    %24 = arith.negf %23 : vector<8x128xf32>
    %25 = math.exp %24 : vector<8x128xf32>
    %cst_25 = arith.constant 1.000000e+00 : f32
    %26 = vector.broadcast %cst_25 : f32 to vector<8x128xf32>
    %27 = arith.addf %26, %25 : vector<8x128xf32>
    %28 = arith.divf %26, %27 : vector<8x128xf32>
    %29 = vector.extract_strided_slice %28 {offsets = [0, 0], sizes = [8, 32], strides = [1, 1]} : vector<8x128xf32> to vector<8x32xf32>
    %30 = vector.extract_strided_slice %28 {offsets = [0, 32], sizes = [8, 32], strides = [1, 1]} : vector<8x128xf32> to vector<8x32xf32>
    %31 = vector.extract_strided_slice %28 {offsets = [0, 96], sizes = [8, 32], strides = [1, 1]} : vector<8x128xf32> to vector<8x32xf32>
    %32 = vector.extract_strided_slice %23 {offsets = [0, 64], sizes = [8, 32], strides = [1, 1]} : vector<8x128xf32> to vector<8x32xf32>
    %33 = math.tanh %32 : vector<8x32xf32>
    %34 = arith.mulf %30, %5 : vector<8x32xf32>
    %35 = arith.mulf %29, %33 : vector<8x32xf32>
    %36 = arith.addf %34, %35 : vector<8x32xf32>
    %37 = math.tanh %36 : vector<8x32xf32>
    %38 = arith.mulf %31, %37 : vector<8x32xf32>
    %39 = tpu.concatenate %38, %3 in 1 : vector<8x32xf32>, vector<8x32xf32> -> vector<8x64xf32>
    %cst_26 = arith.constant dense<0.000000e+00> : vector<8x128xf32>
    %40 = tpu.matmul %39, %9, %cst_26 {dimension_numbers = #tpu.dot_dimension_numbers<[1], [0], [0], [1], [0, 0, 1, 1], [], []>} : vector<8x64xf32>, vector<64x128xf32>, vector<8x128xf32> -> vector<8x128xf32>
    %41 = vector.broadcast %13 : vector<1x128xf32> to vector<8x128xf32>
    %42 = arith.addf %40, %41 : vector<8x128xf32>
    %43 = arith.negf %42 : vector<8x128xf32>
    %44 = math.exp %43 : vector<8x128xf32>
    %cst_27 = arith.constant 1.000000e+00 : f32
    %45 = vector.broadcast %cst_27 : f32 to vector<8x128xf32>
    %46 = arith.addf %45, %44 : vector<8x128xf32>
    %47 = arith.divf %45, %46 : vector<8x128xf32>
    %48 = vector.extract_strided_slice %47 {offsets = [0, 0], sizes = [8, 32], strides = [1, 1]} : vector<8x128xf32> to vector<8x32xf32>
    %49 = vector.extract_strided_slice %47 {offsets = [0, 32], sizes = [8, 32], strides = [1, 1]} : vector<8x128xf32> to vector<8x32xf32>
    %50 = vector.extract_strided_slice %47 {offsets = [0, 96], sizes = [8, 32], strides = [1, 1]} : vector<8x128xf32> to vector<8x32xf32>
    %51 = vector.extract_strided_slice %42 {offsets = [0, 64], sizes = [8, 32], strides = [1, 1]} : vector<8x128xf32> to vector<8x32xf32>
    %52 = math.tanh %51 : vector<8x32xf32>
    %53 = arith.mulf %49, %7 : vector<8x32xf32>
    %54 = arith.mulf %48, %52 : vector<8x32xf32>
    %55 = arith.addf %53, %54 : vector<8x32xf32>
    %56 = math.tanh %55 : vector<8x32xf32>
    %57 = arith.mulf %50, %56 : vector<8x32xf32>
    %c0_28 = arith.constant 0 : index
    %c0_29 = arith.constant 0 : index
    %58 = vector.load %arg7[%c0_28, %c0_29] : memref<1x32xf32, #tpu.memory_space<vmem>>, vector<1x32xf32>
    %c0_30 = arith.constant 0 : index
    %c0_31 = arith.constant 0 : index
    %59 = vector.load %arg8[%c0_30, %c0_31] : memref<1x1xf32, #tpu.memory_space<vmem>>, vector<1x1xf32>
    %60 = vector.broadcast %58 : vector<1x32xf32> to vector<8x32xf32>
    %61 = arith.mulf %57, %60 : vector<8x32xf32>
    %cst_32 = arith.constant dense<0.000000e+00> : vector<8xf32>
    %62 = vector.multi_reduction <add>, %61, %cst_32 [1] : vector<8x32xf32> to vector<8xf32>
    %63 = vector.shape_cast %62 : vector<8xf32> to vector<8x1xf32>
    %64 = vector.broadcast %59 : vector<1x1xf32> to vector<8x1xf32>
    %65 = arith.addf %63, %64 : vector<8x1xf32>
    %c0_33 = arith.constant 0 : index
    %c0_34 = arith.constant 0 : index
    %66 = vector.load %arg9[%c0_33, %c0_34] : memref<8x1xf32, #tpu.memory_space<vmem>>, vector<8x1xf32>
    tpu.vector_store %arg9[%c0_33, %c0_34], %65 {strides = array<i32>} : memref<8x1xf32, #tpu.memory_space<vmem>>, vector<8x1xf32>,
    %67 = tpu.concatenate %38, %57, %36, %55 in 1 : vector<8x32xf32>, vector<8x32xf32>, vector<8x32xf32>, vector<8x32xf32> -> vector<8x128xf32>
    %c0_35 = arith.constant 0 : index
    %c0_36 = arith.constant 0 : index
    %68 = vector.load %arg10[%c0_35, %c0_36] : memref<8x128xf32, #tpu.memory_space<vmem>>, vector<8x128xf32>
    tpu.vector_store %arg10[%c0_35, %c0_36], %67 {strides = array<i32>} : memref<8x128xf32, #tpu.memory_space<vmem>>, vector<8x128xf32>,
    return
  }
}

</mosaic_0001>

<bundles_post_ra>
// kernel: tpu_custom_call.1
= control target key start
LH: loop header
LB: loop body
LE: loop exit
PB: predicated region body
PF: predicated region fallthrough
CT: control target
= control target key end

     0   :  { %s790_s0 = inlined_call_operand.vmem [shape: f32[8,1], index: 0, kind: input, shape index: {}]   ;;  %s791_s1 = inlined_call_operand.vmem [shape: f32[2,8,32], index: 1, kind: input, shape index: {}]   ;;  %s792_s2 = inlined_call_operand.hbm [shape: f32[2,8,32], index: 2, kind: input, shape index: {}]   ;;  %s793_s3 = inlined_call_operand.vmem [shape: f32[1,128], index: 3, kind: input, shape index: {}]   ;;  %s794_s4 = inlined_call_operand.hbm [shape: f32[32,128], index: 4, kind: input, shape index: {}]   ;;  %s795_s5 = inlined_call_operand.hbm [shape: f32[1,64,128], index: 5, kind: input, shape index: {}]   ;;  %s796_s6 = inlined_call_operand.vmem [shape: f32[2,1,128], index: 6, kind: input, shape index: {}]   ;;  %s797_s7 = inlined_call_operand.vmem [shape: f32[1,32], index: 7, kind: input, shape index: {}]   ;;  %s798_s8 = inlined_call_operand.<no memory space> [shape: f32[1,1], index: 8, kind: input, shape index: {}]   ;;  %s799_s9 = inlined_call_operand.vmem [shape: f32[8,1], index: 9, kind: output, shape index: {0}]   ;;  %s800_s10 = inlined_call_operand.hbm [shape: f32[8,128], index: 10, kind: output, shape index: {1}]  }
   0x1   :  { %v16_v0 = vstv %s798_s8 }
   0x2   :  { %17 = vst [vmem:[#allocation2] sm:$0x1] %v16_v0 }
   0x3   :  { %18 = vsyncpa [#allocation4], 0 }
   0x4   :  { %19 = vsyncpa [#allocation7], 0 }
   0x5   :  { %20 = vsyncpa [#allocation5], 0  ;;  %s601_s15 = smov [#allocation6]   ;;  %s602_s17 = smov [#allocation3]  }
   0x6   :  { %s44_s16 = sshll.u32 %s601_s15, 4  ;;  %s30_s18 = sshll.u32 %s602_s17, 4  ;;  %s45_s16 = int_to_ptr.vmem [resolvable:$true] %s44_s16  ;;  %s672_s18 = int_to_ptr.vmem [resolvable:$true] %s30_s18 }
   0x7   :  { %s507_s21 = scalar_lea.hbm %s794_s4, 512 }
   0x8   :  { %p508_p0 = scmp.ne.s32.totalorder %s794_s4, %s507_s21  ;;  %p511_p1 = scmp.lt.u32.totalorder %s507_s21, %s794_s4 }
   0xa   :  { %p513_p2 = pnand %p511_p1, %p508_p0 }
   0xc   :  { %516 = shalt.err (!%p513_p2)
}
   0xd   :  { %s517_s25 = scalar_lea.vmem %s45_s16, 512  ;;  %p522_p4 = scmp.lt.s32.totalorder %s45_s16, %s45_s16 }
   0xe   :  { %p518_p3 = scmp.ne.s32.totalorder %s45_s16, %s517_s25  ;;  %p523_p5 = scmp.lt.s32.totalorder %s517_s25, %s517_s25 }
  0x10   :  { %p524_p6 = por %p523_p5, %p522_p4 }
  0x12   :  { %p525_p7 = pnand %p524_p6, %p518_p3 }
  0x14   :  { %528 = shalt.err (!%p525_p7)
}
  0x15   :  { %s603_s26 = smov 128   ;;  %s604_s27 = smov 8  }
  0x16   :  { %50 = dma.hbm_to_vmem [thread:$0]  %s794_s4, 512, %s45_s16, [#allocation7], %s603_s26, %s603_s26, %s604_s27  }
  0x17   :  { %s529_s12 = scalar_lea.hbm %s792_s2, 256 }
  0x18   :  { %p530_p8 = scmp.ne.s32.totalorder %s792_s2, %s529_s12  ;;  %p533_p9 = scmp.lt.u32.totalorder %s529_s12, %s792_s2 }
  0x1a   :  { %p535_p10 = pnand %p533_p9, %p530_p8 }
  0x1c   :  { %538 = shalt.err (!%p535_p10)
}
  0x1d   :  { %s539_s19 = scalar_lea.vmem %s672_s18, 256  ;;  %p544_p12 = scmp.lt.s32.totalorder %s672_s18, %s672_s18 }
  0x1e   :  { %p540_p11 = scmp.ne.s32.totalorder %s672_s18, %s539_s19  ;;  %p545_p13 = scmp.lt.s32.totalorder %s539_s19, %s539_s19 }
  0x20   :  { %p546_p0 = por %p545_p13, %p544_p12 }
  0x22   :  { %p547_p1 = pnand %p546_p0, %p540_p11 }
  0x24   :  { %550 = shalt.err (!%p547_p1)
}
  0x25   :  { %36 = dma.hbm_to_vmem [thread:$0]  %s792_s2, 256, %s672_s18, [#allocation4], %s603_s26, %s603_s26, %s604_s27  }
  0x26   :  { %s605_s20 = smov [#allocation8]   ;;  %s551_s8 = scalar_lea.hbm %s795_s5, 1024 }
  0x27   :  { %s56_s21 = sshll.u32 %s605_s20, 4  ;;  %p552_p2 = scmp.ne.s32.totalorder %s795_s5, %s551_s8  ;;  %s57_s21 = int_to_ptr.vmem [resolvable:$true] %s56_s21 }
  0x28   :  { %p555_p3 = scmp.lt.u32.totalorder %s551_s8, %s795_s5 }
  0x2a   :  { %p557_p4 = pnand %p555_p3, %p552_p2 }
  0x2c   :  { %560 = shalt.err (!%p557_p4)
}
  0x2d   :  { %s561_s30 = scalar_lea.vmem %s57_s21, 1024  ;;  %p566_p6 = scmp.lt.s32.totalorder %s57_s21, %s57_s21 }
  0x2e   :  { %p562_p5 = scmp.ne.s32.totalorder %s57_s21, %s561_s30  ;;  %p567_p7 = scmp.lt.s32.totalorder %s561_s30, %s561_s30 }
  0x30   :  { %p568_p8 = por %p567_p7, %p566_p6 }
  0x32   :  { %p569_p9 = pnand %p568_p8, %p562_p5 }
  0x34   :  { %572 = shalt.err (!%p569_p9)
}
  0x35   :  { %62 = dma.hbm_to_vmem [thread:$0]  %s795_s5, 1024, %s57_s21, [#allocation7], %s603_s26, %s603_s26, %s604_s27  }
  0x36   :  { %595 = dma.done.wait [#allocation4], 256  }
  0x37   :  { %596 = vsyncadd [#allocation4], 4294967040 }
  0x38   :  { %597 = dma.done.wait [#allocation7], 1536  }
  0x39   :  { %598 = vsyncadd [#allocation7], 4294965760  ;;  %v606_v1 = vmov 0.0|0.0   ;;  %vm607_vm0 = vmmov 0   ;;  %v608_v2 = vmov 0.0   ;;  %v609_v3 = vmov 0  }
  0x3a   :  { %459 = vmatprep.subr.bf16.mxu0 %v606_v1  ;;  %437 = vmatprep.mubr.msk.f32.mxu0 %vm607_vm0, %v608_v2  ;;  %v97_v4 = vld [vmem:[#allocation6] sm:$0xff]  ;;  %v98_v5 = vld [vmem:[#allocation6 + $0x8] sm:$0xff]  ;;  %v99_v6 = vld [vmem:[#allocation6 + $0x10] sm:$0xff]  ;;  %s610_s27 = smov 32   ;;  %vm113_vm1 = vcmask 261120   ;;  %s611_s17 = smov 64  }
  0x3b   :  { %490 = vset.pattern.permute.xlu0 %v609_v3  ;;  %465 = vmatprep.subr.bf16.mxu1 %v606_v1  ;;  %v460_v7 = vpack.c.bf16 %v98_v5, %v97_v4  ;;  %v100_v8 = vld [vmem:[#allocation6 + $0x18] sm:$0xff]  ;;  %v95_v9 = vld [vmem:[%s790_s0] sm:$0xff]  ;;  %v84_v32 = vld [vmem:[#allocation8] sm:$0xff]  ;;  %vm238_vm2 = vcmask 523264   ;;  %vm381_vm3 = vcmask 785408  }
  0x3c   :  { %456 = vmatprep.mubr.msk.f32.mxu1 %vm607_vm0, %v608_v2  ;;  %103 = vperm.xlu0 %490, %v95_v9   ;;  %v81_v10 = vld [vmem:[#allocation3] sm:$0xff]  ;;  %v463_v11 = vpack.c.bf16 %v100_v8, %v99_v6  ;;  %v406_v13 = vld [vmem:[%s793_s3] ss:$0 sm:$0xff]  ;;  %v87_v36 = vld [vmem:[#allocation8 + $0x18] sm:$0xff] }
  0x3d   :  { %461 = vmatpush3.bf16.msra.mxu0 %v460_v7  ;;  %203 = vrot.lane.b32.xlu1 %v81_v10, %s610_s27  ;;  %v78_v12 = vld [vmem:[%s791_s1] sm:$0xff]  ;;  %v88_v38 = vld [vmem:[#allocation8 + $0x20] sm:$0xff]  ;;  %v91_v42 = vld [vmem:[#allocation8 + $0x38] sm:$0xff] }
  0x3e   :  { %462 = vmatprep.subr.bf16.mxu0 %v606_v1  ;;  %v408_v16 = vld [vmem:[%s796_s6] ss:$0 sm:$0xff]  ;;  %v86_v34 = vld [vmem:[#allocation8 + $0x10] sm:$0xff]  ;;  %v83_v46 = vld [vmem:[#allocation3 + $0x8] sm:$0xff] }
  0x3f   :  { %v85_v33 = vld [vmem:[#allocation8 + $0x8] sm:$0xff]  ;;  %v469_v37 = vpack.c.bf16 %v87_v36, %v86_v34  ;;  %v90_v41 = vld [vmem:[#allocation8 + $0x30] sm:$0xff] }
  0x40   :  { %v466_v35 = vpack.c.bf16 %v85_v33, %v84_v32  ;;  %v89_v39 = vld [vmem:[#allocation8 + $0x28] sm:$0xff]  ;;  %v475_v44 = vpack.c.bf16 %v91_v42, %v90_v41  ;;  %v404_v45 = vld [vmem:[%s791_s1 + $0x8] sm:$0xff]  ;;  %v410_v52 = vld [vmem:[%s796_s6 + $0x1] ss:$0 sm:$0xff]  ;;  %s612_s6 = smov 96  }
  0x41   :  { %464 = vmatpush3.bf16.msra.mxu0 %v463_v11  ;;  %v472_v40 = vpack.c.bf16 %v89_v39, %v88_v38  ;;  %v413_v63 = vld [vmem:[%s797_s7] ss:$0 sm:$0xff]  ;;  %s613_s7 = smov [#allocation9]  }
  0x42   :  { %467 = vmatpush3.bf16.msra.mxu1 %v466_v35  ;;  %s392_s21 = sshll.u32 %s613_s7, 4  ;;  %s393_s21 = int_to_ptr.vmem [resolvable:$true] %s392_s21 }
  0x43   :  { %468 = vmatprep.subr.bf16.mxu1 %v606_v1  ;;  %s573_s22 = scalar_lea.vmem %s393_s21, 128  ;;  %p578_p11 = scmp.lt.s32.totalorder %s393_s21, %s393_s21 }
  0x44   :  { %438 = vmatmul.mubr.msk.f32.vlgmr.msra.gmra.mrb[0].mxu0 %vm113_vm1, %v78_v12  ;;  %p574_p10 = scmp.ne.s32.totalorder %s393_s21, %s573_s22  ;;  %p579_p12 = scmp.lt.s32.totalorder %s573_s22, %s573_s22 }
  0x46   :  { %470 = vmatpush3.bf16.msra.mxu1 %v469_v37  ;;  %p580_p13 = por %p579_p12, %p578_p11 }
  0x47   :  { %471 = vmatprep.subr.bf16.mxu1 %v606_v1 }
  0x48   :  { %p581_p0 = pnand %p580_p13, %p574_p10 }
  0x4a   :  { %473 = vmatpush3.bf16.msra.mxu1 %v472_v40 }
  0x4b   :  { %474 = vmatprep.subr.bf16.mxu1 %v606_v1 }
  0x4e   :  { %476 = vmatpush3.bf16.msra.mxu1 %v475_v44 }
  0xaf   :  { %v204_v28 = vpop.permute.xlu1 %203 }
  0xbb   :  { %v104_v14 = vpop.permute.xlu0 %103 }
  0xbc   :  { %v112_v15 = vmul.f32 %v406_v13, %v104_v14 }
 0x117   :  { %v183_v17 = vpop.f32.mrb[0].mxu0 }
 0x118   :  { %v187_v18 = vadd.f32 %v183_v17, %v112_v15  ;;  %v439_v19 = vpop.f32.mrb[1].mxu0 }
 0x11a   :  { %v194_v20 = vadd.f32 %v408_v16, %v187_v18 }
 0x11c   :  { %491 = vtanh.f32 %v194_v20  ;;  %v409_v22 = vmul.f32 -1.442695, %v194_v20 }
 0x11e   :  { %493 = vpow2.f32 %v409_v22 }
 0x126   :  { %v492_v21 = vpop.eup %491 }
 0x127   :  { %208 = vrot.lane.b32.xlu0 %v492_v21, %s611_s17 }
 0x128   :  { %v494_v23 = vpop.eup %493 }
 0x129   :  { %v198_v24 = vadd.f32 1.0, %v494_v23 }
 0x12b   :  { %495 = vrcp.f32 %v198_v24 }
 0x135   :  { %v496_v25 = vpop.eup %495 }
 0x136   :  { %v206_v29 = vmul.f32 %v496_v25, %v204_v28 }
 0x199   :  { %v209_v26 = vpop.permute.xlu0 %208 }
 0x19a   :  { %v211_v27 = vmul.f32 %v496_v25, %v209_v26 }
 0x19c   :  { %213 = vrot.lane.b32.xlu1 %v211_v27, %s610_s27 }
 0x20e   :  { %v214_v30 = vpop.permute.xlu1 %213 }
 0x20f   :  { %v743_v31 = vadd.f32 %v214_v30, %v206_v29 }
 0x211   :  { %497 = vtanh.f32 %v743_v31 }
 0x21b   :  { %v498_v43 = vpop.eup %497 }
 0x21c   :  { %219 = vrot.lane.b32.xlu0 %v498_v43, %s611_s17 }
 0x220   :  { %228 = vrot.lane.b32.xlu0 %v404_v45, %s610_s27 }
 0x224   :  { %320 = vrot.lane.b32.xlu0 %v83_v46, %s610_s27 }
 0x28e   :  { %v220_v47 = vpop.permute.xlu0 %219 }
 0x28f   :  { %v222_v48 = vmul.f32 %v496_v25, %v220_v47 }
 0x291   :  { %224 = vrot.lane.b32.xlu1 %v222_v48, %s610_s27 }
 0x292   :  { %v229_v49 = vpop.permute.xlu0 %228 }
 0x296   :  { %v321_v0 = vpop.permute.xlu0 %320 }
 0x303   :  { %v225_v50 = vpop.permute.xlu1 %224 }
 0x304   :  { %v231_v51 = vsel %vm113_vm1, %v225_v50, %v229_v49 }
 0x305   :  { %457 = vmatmul.mubr.msk.f32.vlgmr.msra.gmra.mrb[0].mxu1 %vm238_vm2, %v231_v51 }
 0x3d8   :  { %v308_v53 = vpop.f32.mrb[0].mxu1 }
 0x3d9   :  { %v309_v54 = vadd.f32 %v410_v52, %v308_v53  ;;  %v458_v55 = vpop.f32.mrb[1].mxu1 }
 0x3db   :  { %499 = vtanh.f32 %v309_v54  ;;  %v412_v57 = vmul.f32 -1.442695, %v309_v54 }
 0x3dd   :  { %501 = vpow2.f32 %v412_v57 }
 0x3e5   :  { %v500_v56 = vpop.eup %499 }
 0x3e6   :  { %325 = vrot.lane.b32.xlu1 %v500_v56, %s611_s17 }
 0x3e7   :  { %v502_v58 = vpop.eup %501 }
 0x3e8   :  { %v315_v59 = vadd.f32 1.0, %v502_v58 }
 0x3ea   :  { %503 = vrcp.f32 %v315_v59 }
 0x3f4   :  { %v504_v60 = vpop.eup %503 }
 0x3f5   :  { %v323_v1 = vmul.f32 %v504_v60, %v321_v0 }
 0x458   :  { %v326_v61 = vpop.permute.xlu1 %325 }
 0x459   :  { %v328_v62 = vmul.f32 %v504_v60, %v326_v61 }
 0x45b   :  { %330 = vrot.lane.b32.xlu1 %v328_v62, %s610_s27 }
 0x45f   :  { %347 = vrot.lane.b32.xlu1 %v413_v63, %s612_s6 }
 0x4cd   :  { %v331_v2 = vpop.permute.xlu1 %330 }
 0x4ce   :  { %v333_v3 = vadd.f32 %v331_v2, %v323_v1 }
 0x4d0   :  { %505 = vtanh.f32 %v333_v3 }
 0x4d1   :  { %v348_v6 = vpop.permute.xlu1 %347 }
 0x4da   :  { %v506_v4 = vpop.eup %505 }
 0x4db   :  { %336 = vrot.lane.b32.xlu0 %v506_v4, %s611_s17 }
 0x54d   :  { %v337_v5 = vpop.permute.xlu0 %336 }
 0x54e   :  { %v339_v7 = vmul.f32 %v504_v60, %v337_v5 }
 0x550   :  { %v350_v8 = vmul.f32 %v348_v6, %v339_v7 }
 0x552   :  { %352 = vrot.lane.b32.xlu0 %v350_v8, %s610_s27 }
 0x556   :  { %368 = vrot.lane.b32.xlu0 %v339_v7, %s611_s17 }
 0x55a   :  { %372 = vrot.lane.b32.xlu0 %v743_v31, %s610_s27 }
 0x55e   :  { %376 = vrot.lane.b32.xlu0 %v333_v3, %s611_s17 }
 0x5c4   :  { %v353_v9 = vpop.permute.xlu0 %352 }
 0x5c5   :  { %v355_v10 = vsel %vm113_vm1, %v353_v9, 0.0 }
 0x5c6   :  { %356 = vadd.xlane.f32.xlu1 %v355_v10 }
 0x5c8   :  { %v369_v11 = vpop.permute.xlu0 %368 }
 0x5c9   :  { %v379_v13 = vsel %vm113_vm1, %v225_v50, %v369_v11 }
 0x5cc   :  { %v373_v12 = vpop.permute.xlu0 %372 }
 0x5cd   :  { %v380_v14 = vsel %vm238_vm2, %v379_v13, %v373_v12 }
 0x5d0   :  { %v377_v15 = vpop.permute.xlu0 %376 }
 0x5d1   :  { %v382_v16 = vsel %vm381_vm3, %v380_v14, %v377_v15 }
 0x5d2   :  { %383 = vst [vmem:[#allocation9] sm:$0xff] %v382_v16 }
 0x5d3   :  { %584 = shalt.err (!%p581_p0)
}
 0x5d4   :  { %s585_s24 = scalar_lea.hbm %s800_s10, 128 }
 0x5d5   :  { %p586_p1 = scmp.ne.s32.totalorder %s800_s10, %s585_s24  ;;  %p589_p2 = scmp.lt.u32.totalorder %s585_s24, %s800_s10 }
 0x5d7   :  { %p591_p3 = pnand %p589_p2, %p586_p1 }
 0x5d9   :  { %594 = shalt.err (!%p591_p3)
}
 0x5da   :  { %395 = dma.vmem_to_hbm [thread:$0]  %s393_s21, 128, %s800_s10, [#allocation5]   ;;  %v414_v17 = vld [vmem:[#allocation2] ss:$0 sm:$0xff]  ;;  %vm365_vm4 = vcmask 7168  }
 0x653   :  { %v357_v18 = vpop.xlane.xlu1 %356 }
 0x654   :  { %v364_v19 = vadd.f32 %v414_v17, %v357_v18 }
 0x656   :  { %366 = vst.msk [vmem:[%s799_s9] sm:$0xff] %vm365_vm4, %v364_v19 }
 0x657   :  { %599 = dma.done.wait [#allocation5], 128  }
 0x658   :  { %600 = vsyncadd [#allocation5], 4294967168 }
 0x659   :  { %401 = vsyncpa [#allocation4], 1 }
 0x65a   :  { %402 = vsyncpa [#allocation7], 1 }
 0x65b   :  { %403 = vsyncpa [#allocation5], 1 }

</bundles_post_ra>
